<compile_context>
chip_gen: v7x
topology: tpu7x:2x2x1
jax: 0.10.0
libtpu: 0.0.40
codegen_flags: <defaults>
</compile_context>

<pallas_src>
import functools

import jax
import jax.numpy as jnp
from jax.experimental import pallas as pl
from jax.experimental.pallas import tpu as pltpu


_SUB = 16             # sublane rounding for single-tile batches (covers bf16)
_MIN_SPLIT_ROWS = 512  # only split the batch across TensorCores above this


def _round_up(a, b):
    return ((a + b - 1) // b) * b


def _num_tensorcores():
    """2 on dual-TensorCore chips (v7x), else 1 (v5e/v6e)."""
    try:
        kind = jax.devices()[0].device_kind.lower()
    except Exception:
        return 1
    return 2 if ("v7" in kind or "7x" in kind) else 1


def _tile_policy(batch, block_m_cap, num_tc):
    """Pick (rows_per_tile, num_tiles) for the batch grid."""
    # Single tile covering the whole batch: default on single-TC chips and for
    # small batches on v7x (splitting tiny work is pure per-step overhead).
    if (num_tc < 2 or batch < _MIN_SPLIT_ROWS) and batch <= block_m_cap:
        return _round_up(batch, _SUB), 1

    # Multi-tile: each tile's rows become output LANES, so tiles must be a
    # multiple of 128 for an unmasked, lane-dense output store.
    cap = max(128, _round_up(block_m_cap, 128))
    tiles = max(1, -(-batch // cap))
    if num_tc >= 2:
        tiles = max(2, tiles)
        tiles += tiles % 2                       # even -> equal work per core
    tile = min(cap, _round_up(-(-batch // tiles), 128))
    grid_m = -(-batch // tile)
    if num_tc >= 2 and grid_m > 1 and grid_m % 2:
        grid_m += 1                              # keep the step count even
    return tile, grid_m


def _mlp_kernel(num_layers, compute_dtype, x_ref, *refs):
    """Fused MLP forward.

    refs = (w0, b0, ..., w_{L-2}, b_{L-2}, wL_T, bL, out_ref)
    Hidden layers: h @ W_i + b_i, ReLU.  Final layer: weight is pre-transposed
    to (1, d_last) so the result is computed as (1, d_last) x (rows, d_last)^T
    -> (1, rows): batch on lanes, lane-dense sigmoid + store.
    """
    out_ref = refs[-1]
    params = refs[:-1]

    # In-kernel cast of the f32 input tile (VPU has slack; halves input HBM).
    h = x_ref[...].astype(compute_dtype)

    for i in range(num_layers - 1):
        w = params[2 * i][...]                       # (in_i, out_i) compute dt
        b = params[2 * i + 1][...]                   # (1, out_i)   f32
        z = jnp.dot(h, w, preferred_element_type=jnp.float32) + b
        h = jnp.maximum(z, 0.0).astype(compute_dtype)        # ReLU (VPU)

    w_t = params[2 * (num_layers - 1)][...]          # (1, d_last) compute dt
    b_l = params[2 * (num_layers - 1) + 1][...]      # (1, 1)      f32
    # A @ B^T contraction (same pattern as q @ k^T): -> (1, rows), f32 acc.
    z_t = jax.lax.dot_general(
        w_t, h,
        dimension_numbers=(((1,), (1,)), ((), ())),
        preferred_element_type=jnp.float32) + b_l
    out_ref[...] = jax.nn.sigmoid(z_t).astype(out_ref.dtype)   # Sigmoid (EUP)


def make_mlp_forward(weights, biases, *, use_bf16=True, block_m=1024,
                     vmem_limit_bytes=None, num_cores=None):
    """One-time parameter prep + jitted fused-MLP forward(x) -> (batch, 1)."""
    num_layers = len(weights)
    n_in = weights[0].shape[0]
    compute_dtype = jnp.bfloat16 if use_bf16 else jnp.float32
    num_tc = _num_tensorcores() if num_cores is None else num_cores

    # ---- one-time parameter prep (cast / reshape / transpose) ---------------
    flat_params = []
    for i, (w, b) in enumerate(zip(weights, biases)):
        w = jnp.asarray(w)
        b = jnp.asarray(b)
        if i < num_layers - 1:
            flat_params.append(w.astype(compute_dtype))              # (in, out)
            flat_params.append(b.reshape(1, -1).astype(jnp.float32))  # (1, out)
        else:
            # Final Linear(->1): store transposed (1, d_last) so the kernel's
            # result is lane-dense in the batch dimension.
            flat_params.append(w.astype(compute_dtype).T.reshape(1, -1))
            flat_params.append(b.reshape(1, 1).astype(jnp.float32))
    flat_params = [jax.device_put(p) for p in flat_params]

    kernel = functools.partial(_mlp_kernel, num_layers, compute_dtype)

    def forward(x, *params):
        batch = x.shape[0]
        tile, grid_m = _tile_policy(batch, block_m, num_tc)
        padded_batch = tile * grid_m
        if padded_batch != batch:
            x = jnp.pad(x, ((0, padded_batch - batch), (0, 0)))

        in_specs = [pl.BlockSpec((tile, n_in), lambda i: (i, 0))]
        for p in params:
            # Constant index_map: parameters are never re-DMA'd across tiles.
            in_specs.append(pl.BlockSpec(p.shape, lambda i: (0, 0)))
        # Lane-dense output row: block (1, tile) of a (1, padded_batch) array.
        out_specs = pl.BlockSpec((1, tile), lambda i: (0, i))

        out = pl.pallas_call(
            kernel,
            out_shape=jax.ShapeDtypeStruct((1, padded_batch), jnp.float32),
            grid_spec=pltpu.PrefetchScalarGridSpec(
                num_scalar_prefetch=0,
                grid=(grid_m,),
                in_specs=in_specs,
                out_specs=out_specs,
            ),
            compiler_params=pltpu.CompilerParams(
                dimension_semantics=("parallel",),
                vmem_limit_bytes=vmem_limit_bytes,
            ),
        )(x, *params)
        return out[0, :batch].reshape(batch, 1)

    fwd = jax.jit(forward)
    return lambda x: fwd(jnp.asarray(x, jnp.float32), *flat_params)


def init_params(key, layers, n_inputs):
    """Deterministic init mimicking PyTorch nn.Linear defaults
    (uniform +/- 1/sqrt(fan_in)).  Weights stored as (in, out)."""
    dims = [n_inputs] + list(layers) + [1]
    weights, biases = [], []
    for i in range(len(dims) - 1):
        fan_in, fan_out = dims[i], dims[i + 1]
        key, kw, kb = jax.random.split(key, 3)
        bound = 1.0 / jnp.sqrt(jnp.float32(fan_in))
        weights.append(jax.random.uniform(
            kw, (fan_in, fan_out), jnp.float32, -bound, bound))
        biases.append(jax.random.uniform(
            kb, (fan_out,), jnp.float32, -bound, bound))
    return weights, biases


def reference_forward(x, weights, biases, *, use_bf16=True):
    """Plain-JAX reference with precision matching the kernel."""
    cdt = jnp.bfloat16 if use_bf16 else jnp.float32
    h = x.astype(cdt)
    for i, (w, b) in enumerate(zip(weights, biases)):
        z = jnp.dot(h, w.astype(cdt), preferred_element_type=jnp.float32) + b
        if i < len(weights) - 1:
            h = jnp.maximum(z, 0.0).astype(cdt)
        else:
            h = jax.nn.sigmoid(z)
    return h


if __name__ == "__main__":
    key = jax.random.PRNGKey(0)

    # Model(layers=[32, 16], n_inputs=32)
    layers = [32, 16]
    n_inputs = 32

    key_p, key_x = jax.random.split(key)
    weights, biases = init_params(key_p, layers, n_inputs)

    # Case 1: bf16 weight path, single large tile (v5e/v6e) / small-batch
    # single tile (v7x).
    fwd_bf16 = make_mlp_forward(weights, biases, use_bf16=True)
    batch = 64
    x = jax.random.normal(key_x, (batch, n_inputs), jnp.float32)
    out = jax.block_until_ready(fwd_bf16(x))
    ref = reference_forward(x, weights, biases, use_bf16=True)
    assert out.shape == (batch, 1), out.shape
    assert jnp.allclose(out, ref, atol=1e-4, rtol=1e-4), \
        f"max diff {jnp.max(jnp.abs(out - ref))}"

    # Case 2: ragged batch (exercises row padding) with the full-f32 path.
    fwd_f32 = make_mlp_forward(weights, biases, use_bf16=False)
    batch2 = 13
    x2 = jax.random.normal(jax.random.fold_in(key_x, 1),
                           (batch2, n_inputs), jnp.float32)
    out2 = jax.block_until_ready(fwd_f32(x2))
    ref2 = reference_forward(x2, weights, biases, use_bf16=False)
    assert out2.shape == (batch2, 1), out2.shape
    assert jnp.allclose(out2, ref2, atol=1e-5, rtol=1e-5), \
        f"max diff {jnp.max(jnp.abs(out2 - ref2))}"

    # Case 3: force a multi-tile "parallel" grid (128-multiple tiles,
    # lane-dense output blocks) regardless of chip generation.
    fwd_tiled = make_mlp_forward(weights, biases, use_bf16=True, block_m=256)
    batch3 = 600
    x3 = jax.random.normal(jax.random.fold_in(key_x, 2),
                           (batch3, n_inputs), jnp.float32)
    out3 = jax.block_until_ready(fwd_tiled(x3))
    ref3 = reference_forward(x3, weights, biases, use_bf16=True)
    assert out3.shape == (batch3, 1), out3.shape
    assert jnp.allclose(out3, ref3, atol=1e-4, rtol=1e-4), \
        f"max diff {jnp.max(jnp.abs(out3 - ref3))}"

    print("KERNEL_OK")
</pallas_src>

<mosaic_0001>
module attributes {stable_mosaic.version = 11 : i64} {
  func.func @_mlp_kernel(%arg0: i32, %arg1: memref<64x32xf32, #tpu.memory_space<vmem>>, %arg2: memref<32x32xbf16, #tpu.memory_space<vmem>>, %arg3: memref<1x32xf32, #tpu.memory_space<vmem>>, %arg4: memref<32x16xbf16, #tpu.memory_space<vmem>>, %arg5: memref<1x16xf32, #tpu.memory_space<vmem>>, %arg6: memref<1x16xbf16, #tpu.memory_space<vmem>>, %arg7: memref<1x1xf32, #tpu.memory_space<vmem>>, %arg8: memref<1x64xf32, #tpu.memory_space<vmem>>) attributes {dimension_semantics = [#tpu.dimension_semantics<parallel>], iteration_bounds = array<i64: 1>, scalar_prefetch = 0 : i64, scratch_operands = 0 : i64, tpu.core_type = #tpu.core_type<tc>, window_params = [{transform_indices = @transform_0, window_bounds = array<i64: 64, 32>}, {pipeline_mode = #tpu.pipeline_mode<synchronous>, transform_indices = @transform_1, window_bounds = array<i64: 32, 32>}, {pipeline_mode = #tpu.pipeline_mode<synchronous>, transform_indices = @transform_2, window_bounds = array<i64: 1, 32>}, {pipeline_mode = #tpu.pipeline_mode<synchronous>, transform_indices = @transform_3, window_bounds = array<i64: 32, 16>}, {pipeline_mode = #tpu.pipeline_mode<synchronous>, transform_indices = @transform_4, window_bounds = array<i64: 1, 16>}, {pipeline_mode = #tpu.pipeline_mode<synchronous>, transform_indices = @transform_5, window_bounds = array<i64: 1, 16>}, {pipeline_mode = #tpu.pipeline_mode<synchronous>, transform_indices = @transform_6, window_bounds = array<i64: 1, 1>}, {transform_indices = @transform_7, window_bounds = array<i64: 1, 64>}]} {
    %c0 = arith.constant 0 : index
    %c0_0 = arith.constant 0 : index
    %0 = vector.load %arg1[%c0, %c0_0] : memref<64x32xf32, #tpu.memory_space<vmem>>, vector<64x32xf32>
    %1 = arith.truncf %0 : vector<64x32xf32> to vector<64x32xbf16>
    %c0_1 = arith.constant 0 : index
    %c0_2 = arith.constant 0 : index
    %2 = vector.load %arg2[%c0_1, %c0_2] : memref<32x32xbf16, #tpu.memory_space<vmem>>, vector<32x32xbf16>
    %c0_3 = arith.constant 0 : index
    %c0_4 = arith.constant 0 : index
    %3 = vector.load %arg3[%c0_3, %c0_4] : memref<1x32xf32, #tpu.memory_space<vmem>>, vector<1x32xf32>
    %cst = arith.constant dense<0.000000e+00> : vector<64x32xf32>
    %4 = tpu.matmul %1, %2, %cst {dimension_numbers = #tpu.dot_dimension_numbers<[1], [0], [0], [1], [0, 0, 1, 1], [], []>} : vector<64x32xbf16>, vector<32x32xbf16>, vector<64x32xf32> -> vector<64x32xf32>
    %5 = vector.broadcast %3 : vector<1x32xf32> to vector<64x32xf32>
    %6 = arith.addf %4, %5 : vector<64x32xf32>
    %cst_5 = arith.constant 0.000000e+00 : f32
    %7 = vector.broadcast %cst_5 : f32 to vector<64x32xf32>
    %8 = arith.maximumf %6, %7 : vector<64x32xf32>
    %9 = arith.truncf %8 : vector<64x32xf32> to vector<64x32xbf16>
    %c0_6 = arith.constant 0 : index
    %c0_7 = arith.constant 0 : index
    %10 = vector.load %arg4[%c0_6, %c0_7] : memref<32x16xbf16, #tpu.memory_space<vmem>>, vector<32x16xbf16>
    %c0_8 = arith.constant 0 : index
    %c0_9 = arith.constant 0 : index
    %11 = vector.load %arg5[%c0_8, %c0_9] : memref<1x16xf32, #tpu.memory_space<vmem>>, vector<1x16xf32>
    %cst_10 = arith.constant dense<0.000000e+00> : vector<64x16xf32>
    %12 = tpu.matmul %9, %10, %cst_10 {dimension_numbers = #tpu.dot_dimension_numbers<[1], [0], [0], [1], [0, 0, 1, 1], [], []>} : vector<64x32xbf16>, vector<32x16xbf16>, vector<64x16xf32> -> vector<64x16xf32>
    %13 = vector.broadcast %11 : vector<1x16xf32> to vector<64x16xf32>
    %14 = arith.addf %12, %13 : vector<64x16xf32>
    %cst_11 = arith.constant 0.000000e+00 : f32
    %15 = vector.broadcast %cst_11 : f32 to vector<64x16xf32>
    %16 = arith.maximumf %14, %15 : vector<64x16xf32>
    %17 = arith.truncf %16 : vector<64x16xf32> to vector<64x16xbf16>
    %c0_12 = arith.constant 0 : index
    %c0_13 = arith.constant 0 : index
    %18 = vector.load %arg6[%c0_12, %c0_13] : memref<1x16xbf16, #tpu.memory_space<vmem>>, vector<1x16xbf16>
    %c0_14 = arith.constant 0 : index
    %c0_15 = arith.constant 0 : index
    %19 = vector.load %arg7[%c0_14, %c0_15] : memref<1x1xf32, #tpu.memory_space<vmem>>, vector<1x1xf32>
    %cst_16 = arith.constant dense<0.000000e+00> : vector<1x64xf32>
    %20 = tpu.matmul %18, %17, %cst_16 {dimension_numbers = #tpu.dot_dimension_numbers<[1], [1], [0], [0], [0, 0, 1, 0], [], []>} : vector<1x16xbf16>, vector<64x16xbf16>, vector<1x64xf32> -> vector<1x64xf32>
    %21 = vector.broadcast %19 : vector<1x1xf32> to vector<1x64xf32>
    %22 = arith.addf %20, %21 : vector<1x64xf32>
    %23 = arith.negf %22 : vector<1x64xf32>
    %24 = math.exp %23 : vector<1x64xf32>
    %cst_17 = arith.constant 1.000000e+00 : f32
    %25 = vector.broadcast %cst_17 : f32 to vector<1x64xf32>
    %26 = arith.addf %25, %24 : vector<1x64xf32>
    %27 = arith.divf %25, %26 : vector<1x64xf32>
    %c0_18 = arith.constant 0 : index
    %c0_19 = arith.constant 0 : index
    %28 = vector.load %arg8[%c0_18, %c0_19] : memref<1x64xf32, #tpu.memory_space<vmem>>, vector<1x64xf32>
    tpu.vector_store %arg8[%c0_18, %c0_19], %27 {strides = array<i32>} : memref<1x64xf32, #tpu.memory_space<vmem>>, vector<1x64xf32>,
    return
  }
  func.func @transform_0(%arg0: i32) -> (i32, i32) {
    %c0_i32 = arith.constant 0 : i32
    %c0_i32_0 = arith.constant 0 : i32
    return %arg0, %c0_i32 : i32, i32
  }
  func.func @transform_1(%arg0: i32) -> (i32, i32) {
    %c0_i32 = arith.constant 0 : i32
    %c0_i32_0 = arith.constant 0 : i32
    %c0_i32_1 = arith.constant 0 : i32
    return %c0_i32, %c0_i32_0 : i32, i32
  }
  func.func @transform_2(%arg0: i32) -> (i32, i32) {
    %c0_i32 = arith.constant 0 : i32
    %c0_i32_0 = arith.constant 0 : i32
    %c0_i32_1 = arith.constant 0 : i32
    return %c0_i32, %c0_i32_0 : i32, i32
  }
  func.func @transform_3(%arg0: i32) -> (i32, i32) {
    %c0_i32 = arith.constant 0 : i32
    %c0_i32_0 = arith.constant 0 : i32
    %c0_i32_1 = arith.constant 0 : i32
    return %c0_i32, %c0_i32_0 : i32, i32
  }
  func.func @transform_4(%arg0: i32) -> (i32, i32) {
    %c0_i32 = arith.constant 0 : i32
    %c0_i32_0 = arith.constant 0 : i32
    %c0_i32_1 = arith.constant 0 : i32
    return %c0_i32, %c0_i32_0 : i32, i32
  }
  func.func @transform_5(%arg0: i32) -> (i32, i32) {
    %c0_i32 = arith.constant 0 : i32
    %c0_i32_0 = arith.constant 0 : i32
    %c0_i32_1 = arith.constant 0 : i32
    return %c0_i32, %c0_i32_0 : i32, i32
  }
  func.func @transform_6(%arg0: i32) -> (i32, i32) {
    %c0_i32 = arith.constant 0 : i32
    %c0_i32_0 = arith.constant 0 : i32
    %c0_i32_1 = arith.constant 0 : i32
    return %c0_i32, %c0_i32_0 : i32, i32
  }
  func.func @transform_7(%arg0: i32) -> (i32, i32) {
    %c0_i32 = arith.constant 0 : i32
    %c0_i32_0 = arith.constant 0 : i32
    return %c0_i32, %arg0 : i32, i32
  }
}

</mosaic_0001>

<bundles_post_ra>
// kernel: forward.1
= control target key start
LH: loop header
LB: loop body
LE: loop exit
PB: predicated region body
PF: predicated region fallthrough
CT: control target
= control target key end

     0   :  { %s579_s0 = inlined_call_operand.vmem [shape: f32[64,32], index: 0, kind: input, shape index: {}]   ;;  %s580_s1 = inlined_call_operand.vmem [shape: bf16[32,32], index: 1, kind: input, shape index: {}]   ;;  %s581_s2 = inlined_call_operand.vmem [shape: f32[1,32], index: 2, kind: input, shape index: {}]   ;;  %s582_s3 = inlined_call_operand.vmem [shape: bf16[32,16], index: 3, kind: input, shape index: {}]   ;;  %s583_s4 = inlined_call_operand.vmem [shape: f32[1,16], index: 4, kind: input, shape index: {}]   ;;  %s584_s5 = inlined_call_operand.vmem [shape: bf16[1,16], index: 5, kind: input, shape index: {}]   ;;  %s585_s6 = inlined_call_operand.<no memory space> [shape: f32[1,1], index: 6, kind: input, shape index: {}]   ;;  %s586_s7 = inlined_call_operand.hbm [shape: f32[1,64], index: 7, kind: output, shape index: {}]  }
   0x1   :  { %v12_v0 = vstv %s585_s6 }
   0x2   :  { %13 = vst [vmem:[#allocation2] sm:$0x1] %v12_v0 }
   0x3   :  { %v430_v1 = vld [vmem:[%s580_s1] sm:$0xff]   ;;  %v431_v2 = vld [vmem:[%s580_s1 + $0x8] sm:$0xff]   ;;  %vm65_vm0 = vcmask 261120   ;;  %v32_v6 = vld [vmem:[%s579_s0 + $0x10] sm:$0xff] }
   0x4   :  { %389 = vmatprep.subr.bf16.mxu1 %v430_v1  ;;  %v30_v3 = vld [vmem:[%s579_s0] sm:$0xff]  ;;  %v31_v4 = vld [vmem:[%s579_s0 + $0x8] sm:$0xff]  ;;  %v33_v7 = vld [vmem:[%s579_s0 + $0x18] sm:$0xff] }
   0x5   :  { %390 = vmatpush3.bf16.msra.mxu1 %v430_v1  ;;  %v38_v5 = vpack.c.bf16 %v31_v4, %v30_v3  ;;  %v34_v8 = vld [vmem:[%s579_s0 + $0x20] sm:$0xff]  ;;  %v35_v9 = vld [vmem:[%s579_s0 + $0x28] sm:$0xff]  ;;  %v39_v11 = vpack.c.bf16 %v33_v7, %v32_v6 }
   0x6   :  { %391 = vmatprep.subr.bf16.mxu1 %v431_v2  ;;  %v432_v10 = vld [vmem:[%s582_s3] sm:$0xff]  }
   0x7   :  { %393 = vmatprep.mubr.msk.bf16.mxu1 %vm65_vm0, %v38_v5 }
   0x8   :  { %14 = vsyncpa [#allocation4], 0  ;;  %v40_v12 = vpack.c.bf16 %v35_v9, %v34_v8  ;;  %v36_v13 = vld [vmem:[%s579_s0 + $0x30] sm:$0xff]  ;;  %v37_v14 = vld [vmem:[%s579_s0 + $0x38] sm:$0xff]  ;;  %v462_v46 = vmov 0.0   ;;  %vm463_vm1 = vmmov 0  }
   0x9   :  { %392 = vmatpush3.bf16.msra.mxu1 %v431_v2  ;;  %v41_v15 = vpack.c.bf16 %v37_v14, %v36_v13  ;;  %v433_v16 = vld [vmem:[%s582_s3 + $0x8] sm:$0xff]   ;;  %v356_v17 = vld [vmem:[%s581_s2] ss:$0 sm:$0xff]  ;;  %413 = vmatprep.subr.bf16.mxu0 %v462_v46  ;;  %v464_v48 = vmov 0   ;;  %vm278_vm2 = vcmask 130048   ;;  %s465_s27 = smov [#allocation3]  }
   0xa   :  { %401 = vmatprep.subr.bf16.mxu1 %v432_v10  ;;  %421 = vmatprep.mubr.msk.bf16.mxu0 %vm463_vm1, %v462_v46  ;;  %v268_v47 = vld [vmem:[#allocation2] sm:$0x1]  ;;  %s348_s28 = sshll.u32 %s465_s27, 4  ;;  %vm340_vm3 = vcmask 516096   ;;  %s349_s28 = int_to_ptr.vmem [resolvable:$true] %s348_s28 }
   0xb   :  { %429 = vset.pattern.permute.xlu0 %v464_v48  ;;  %v363_v49 = vld [vmem:[%s583_s4] ss:$0 sm:$0xff]  ;;  %s442_s29 = scalar_lea.vmem %s349_s28, 32  ;;  %p443_p1 = scmp.lt.s32.totalorder %s349_s28, %s349_s28 }
   0xc   :  { %394 = vmatmul.mubr.msk.bf16.vlgmr.msra.gmra.mrb[0].mxu1 %vm65_vm0, %v39_v11  ;;  %271 = vperm.xlu0 %429, %v268_v47  }
   0xd   :  { %397 = vmatprep.mubr.msk.bf16.mxu1 %vm65_vm0, %v40_v12  ;;  %402 = vmatpush3.bf16.msra.mxu1 %v432_v10 }
   0xe   :  { %403 = vmatprep.subr.bf16.mxu1 %v433_v16 }
  0x11   :  { %404 = vmatpush3.bf16.msra.mxu1 %v433_v16 }
  0x14   :  { %398 = vmatmul.mubr.msk.bf16.gmra.mrb[4].mxu1 %vm65_vm0, %v41_v15 }
  0xdf   :  { %v395_v18 = vpop.f32.mrb[0].mxu1 }
  0xe0   :  { %v121_v19 = vadd.f32 %v395_v18, %v356_v17  ;;  %v112_v20 = vpop.f32.mrb[1].mxu1  ;;  %v267_v18 = vld [vmem:[%s584_s5] sm:$0x1]  ;;  %s438_s5 = scalar_lea.vmem %s349_s28, 16 }
  0xe1   :  { %v113_v21 = vadd.f32 %v356_v17, %v112_v20  ;;  %v396_v22 = vpop.f32.mrb[2].mxu1  ;;  %p439_p0 = scmp.ne.s32.totalorder %s349_s28, %s438_s5  ;;  %p444_p2 = scmp.lt.s32.totalorder %s442_s29, %s438_s5 }
  0xe2   :  { %v124_v23 = vadd.f32 %v396_v22, %v356_v17  ;;  %v115_v24 = vpop.f32.mrb[3].mxu1  ;;  %v145_v26 = vmax.f32 %v121_v19, 0.0  ;;  %v274_v19 = vlaneseq  ;;  %v272_v22 = vpop.permute.xlu0 %271 }
  0xe3   :  { %v116_v25 = vadd.f32 %v356_v17, %v115_v24  ;;  %v143_v28 = vmax.f32 %v113_v21, 0.0  ;;  %p445_p3 = por %p444_p2, %p443_p1 }
  0xe4   :  { %v146_v27 = vmax.f32 %v124_v23, 0.0  ;;  %v275_v20 = vshrl.u32 %v274_v19, 7 }
  0xe5   :  { %v144_v29 = vmax.f32 %v116_v25, 0.0  ;;  %p446_p4 = pnand %p445_p3, %p439_p0 }
  0xe6   :  { %v152_v30 = vpack.c.bf16 %v146_v27, %v145_v26  ;;  %v276_v21 = vsub.s32 0, %v275_v20 }
  0xe7   :  { %v151_v31 = vpack.c.bf16 %v144_v29, %v143_v28  ;;  %v399_v32 = vpop.f32.mrb[4].mxu1 }
  0xe8   :  { %v137_v33 = vadd.f32 %v399_v32, %v356_v17  ;;  %v128_v34 = vpop.f32.mrb[5].mxu1  ;;  %v277_v23 = vrot.slane %v272_v22, %v276_v21 }
  0xe9   :  { %v129_v35 = vadd.f32 %v356_v17, %v128_v34  ;;  %405 = vmatprep.mubr.msk.bf16.mxu1 %vm65_vm0, %v151_v31  ;;  %v400_v36 = vpop.f32.mrb[6].mxu1 }
  0xea   :  { %v149_v37 = vmax.f32 %v137_v33, 0.0  ;;  %v140_v38 = vadd.f32 %v400_v36, %v356_v17  ;;  %406 = vmatmul.mubr.msk.bf16.vlgmr.msra.gmra.mrb[8].mxu1 %vm65_vm0, %v152_v30  ;;  %v131_v39 = vpop.f32.mrb[7].mxu1 }
  0xeb   :  { %v147_v40 = vmax.f32 %v129_v35, 0.0  ;;  %v132_v41 = vadd.f32 %v356_v17, %v131_v39 }
  0xec   :  { %v150_v42 = vmax.f32 %v140_v38, 0.0 }
  0xed   :  { %v148_v43 = vmax.f32 %v132_v41, 0.0 }
  0xee   :  { %v154_v44 = vpack.c.bf16 %v150_v42, %v149_v37 }
  0xef   :  { %v153_v45 = vpack.c.bf16 %v148_v43, %v147_v40 }
  0xf1   :  { %409 = vmatprep.mubr.msk.bf16.mxu1 %vm65_vm0, %v153_v45 }
  0xf2   :  { %410 = vmatmul.mubr.msk.bf16.gmra.mrb[12].mxu1 %vm65_vm0, %v154_v44 }
 0x1bd   :  { %v407_v50 = vpop.f32.mrb[8].mxu1 }
 0x1be   :  { %v233_v51 = vadd.f32 %v407_v50, %v363_v49  ;;  %v224_v52 = vpop.f32.mrb[9].mxu1 }
 0x1bf   :  { %v225_v53 = vadd.f32 %v363_v49, %v224_v52  ;;  %v408_v54 = vpop.f32.mrb[10].mxu1 }
 0x1c0   :  { %v236_v55 = vadd.f32 %v408_v54, %v363_v49  ;;  %v227_v56 = vpop.f32.mrb[11].mxu1  ;;  %v257_v58 = vmax.f32 %v233_v51, 0.0 }
 0x1c1   :  { %v228_v57 = vadd.f32 %v363_v49, %v227_v56  ;;  %v255_v60 = vmax.f32 %v225_v53, 0.0 }
 0x1c2   :  { %v258_v59 = vmax.f32 %v236_v55, 0.0 }
 0x1c3   :  { %v256_v61 = vmax.f32 %v228_v57, 0.0 }
 0x1c4   :  { %v264_v62 = vpack.c.bf16 %v258_v59, %v257_v58 }
 0x1c5   :  { %v411_v63 = vpop.f32.mrb[12].mxu1  ;;  %v263_v0 = vpack.c.bf16 %v256_v61, %v255_v60 }
 0x1c6   :  { %v249_v1 = vadd.f32 %v411_v63, %v363_v49  ;;  %v240_v2 = vpop.f32.mrb[13].mxu1  ;;  %v286_v15 = vsel %vm278_vm2, %v264_v62, 0 }
 0x1c7   :  { %v241_v3 = vadd.f32 %v363_v49, %v240_v2  ;;  %v412_v4 = vpop.f32.mrb[14].mxu1  ;;  %v283_v5 = vsel %vm278_vm2, %v263_v0, 0 }
 0x1c8   :  { %v261_v6 = vmax.f32 %v249_v1, 0.0  ;;  %v252_v7 = vadd.f32 %v412_v4, %v363_v49  ;;  %414 = vmatpush3.bf16.xpose.msra.mxu0 %v283_v5  ;;  %v243_v8 = vpop.f32.mrb[15].mxu1 }
 0x1c9   :  { %v259_v9 = vmax.f32 %v241_v3, 0.0  ;;  %v244_v10 = vadd.f32 %v363_v49, %v243_v8  ;;  %415 = vmatprep.subr.bf16.mxu0 %v462_v46 }
 0x1ca   :  { %v262_v11 = vmax.f32 %v252_v7, 0.0 }
 0x1cb   :  { %v260_v12 = vmax.f32 %v244_v10, 0.0 }
 0x1cc   :  { %v266_v13 = vpack.c.bf16 %v262_v11, %v261_v6 }
 0x1cd   :  { %v265_v14 = vpack.c.bf16 %v260_v12, %v259_v9 }
 0x1ce   :  { %v292_v17 = vsel %vm278_vm2, %v266_v13, 0 }
 0x1cf   :  { %v289_v16 = vsel %vm278_vm2, %v265_v14, 0 }
 0x1d0   :  { %416 = vmatpush3.bf16.xpose.msra.mxu0 %v286_v15 }
 0x1d1   :  { %417 = vmatprep.subr.bf16.mxu0 %v462_v46 }
 0x1d8   :  { %418 = vmatpush3.bf16.xpose.msra.mxu0 %v289_v16 }
 0x1d9   :  { %419 = vmatprep.subr.bf16.mxu0 %v462_v46 }
 0x1e0   :  { %420 = vmatpush3.bf16.xpose.msra.mxu0 %v292_v17 }
 0x1e7   :  { %422 = vmatmul.mubr.msk.bf16.vlgmr.msra.gmra.mrb[0].mxu0 %vm278_vm2, %v267_v18 }
 0x2ba   :  { %v328_v24 = vpop.f32.mrb[0].mxu0 }
 0x2bb   :  { %v329_v25 = vadd.f32 %v328_v24, %v277_v23  ;;  %v423_v26 = vpop.f32.mrb[1].mxu0 }
 0x2bc   :  { %v331_v27 = vpop.f32.mrb[2].mxu0 }
 0x2bd   :  { %v371_v28 = vmul.f32 -1.442695, %v329_v25  ;;  %v424_v29 = vpop.f32.mrb[3].mxu0 }
 0x2bf   :  { %434 = vpow2.f32 %v371_v28 }
 0x2c9   :  { %v435_v30 = vpop.eup %434 }
 0x2ca   :  { %v337_v31 = vadd.f32 1.0, %v435_v30 }
 0x2cc   :  { %436 = vrcp.f32 %v337_v31 }
 0x2d6   :  { %v437_v32 = vpop.eup %436 }
 0x2d7   :  { %341 = vst.msk [vmem:[#allocation3] sm:$0x1] %vm340_vm3, %v437_v32 }
 0x2d8   :  { %449 = shalt.err (!%p446_p4)
}
 0x2d9   :  { %s450_s9 = scalar_lea.hbm %s586_s7, 16 }
 0x2da   :  { %p451_p5 = scmp.ne.s32.totalorder %s586_s7, %s450_s9  ;;  %p454_p6 = scmp.lt.u32.totalorder %s450_s9, %s586_s7 }
 0x2dc   :  { %p456_p7 = pnand %p454_p6, %p451_p5 }
 0x2de   :  { %459 = shalt.err (!%p456_p7)
}
 0x2df   :  { %351 = dma.vmem_to_hbm [thread:$0]  %s349_s28, 16, %s586_s7, [#allocation4]  }
 0x2e0   :  { %460 = dma.done.wait [#allocation4], 16  }
 0x2e1   :  { %461 = vsyncadd [#allocation4], 4294967280 }
 0x2e2   :  { %355 = vsyncpa [#allocation4], 1 }

</bundles_post_ra>
